<compile_context>
chip_gen: v5e
topology: v5e:2x2
jax: 0.10.0
libtpu: 0.0.40
codegen_flags: <defaults>
</compile_context>

<pallas_src>
import math
from typing import NamedTuple, Optional, Tuple

import jax
import jax.numpy as jnp
from jax.experimental import pallas as pl
from jax.experimental.pallas import tpu as pltpu


class TileBatch(NamedTuple):
    """Minimal stand-in for the project's TileBatch container."""
    SAT_imgs: jax.Array      # NCHW satellite imagery
    other_imgs: jax.Array    # another field the selector ignores


# --------------------------------------------------------------------------- #
# Fast path — exactly what ImageSelector.forward does.                         #
# --------------------------------------------------------------------------- #
def image_selector_forward(x: TileBatch) -> jax.Array:
    """JAX equivalent of ImageSelector.forward: pure field selection, no kernel."""
    assert isinstance(x, TileBatch)
    return x.SAT_imgs   # no copy, no HBM traffic — the right answer on all TPUs


# --------------------------------------------------------------------------- #
# Optional Pallas identity-copy kernel (only if a kernel boundary is required) #
# --------------------------------------------------------------------------- #
_TILE_BYTES = 2 << 20     # <= 2 MiB per tile: 4 pipelined buffers stay well
                          # under v5e's 16 MiB scoped-VMEM default (and v7x's
                          # smaller 64 MiB core).
_MAX_COLS = 32768         # lane-dense cap for the flattened slab's last dim.


def _identity_copy_kernel(x_ref, o_ref):
    o_ref[...] = x_ref[...]


def _lane_dense_shape(total: int) -> Optional[Tuple[int, int]]:
    """Pick (rows, cols) with cols a multiple of 128, preferring rows % 8 == 0
    and the widest cols (lane-dense stores are the biggest copy-kernel lever)."""
    best = None
    best_rows_ok = False
    c = 128
    while c <= min(total, _MAX_COLS):
        if total % c == 0:
            rows = total // c
            rows_ok = (rows % 8 == 0)
            if (best is None
                    or (rows_ok and not best_rows_ok)
                    or (rows_ok == best_rows_ok and c > best[1])):
                best, best_rows_ok = (rows, c), rows_ok
        c += 128
    return best   # None if total is not a multiple of 128


def _choose_row_tile(rows: int, cols: int, itemsize: int) -> int:
    """Largest row tile (multiple of 8, dividing rows, <= ~_TILE_BYTES)."""
    if rows <= 8:
        return rows                                   # single block; full extent is legal
    budget_rows = max(8, _TILE_BYTES // (cols * itemsize))
    tm = max(8, min(rows, (budget_rows // 8) * 8))
    while tm >= 8:
        if rows % tm == 0:
            return tm
        tm -= 8
    return rows                                       # fallback: one full-extent block


def _pallas_identity_2d(x2d: jax.Array, tm: int) -> jax.Array:
    """Tiled, pipelined, lane-dense identity copy of a 2D slab."""
    rows, cols = x2d.shape
    bytes_accessed = 2 * rows * cols * x2d.dtype.itemsize
    return pl.pallas_call(
        _identity_copy_kernel,
        out_shape=jax.ShapeDtypeStruct((rows, cols), x2d.dtype),
        grid=(pl.cdiv(rows, tm),),
        in_specs=[pl.BlockSpec((tm, cols), lambda i: (i, 0))],
        out_specs=pl.BlockSpec((tm, cols), lambda i: (i, 0)),
        # Output aliases the input buffer: no new HBM allocation; fully
        # in-place when the caller donates the input at a jit boundary.
        input_output_aliases={0: 0},
        compiler_params=pltpu.CompilerParams(
            dimension_semantics=("parallel",),        # shards rows across v7x's 2 TCs
        ),
        cost_estimate=pl.CostEstimate(
            flops=0, transcendentals=0, bytes_accessed=bytes_accessed),
    )(x2d)


def image_selector_forward_pallas(x: TileBatch) -> jax.Array:
    """ImageSelector.forward with a Pallas kernel boundary (identity copy)."""
    assert isinstance(x, TileBatch)
    sat = x.SAT_imgs
    shape = sat.shape
    total = math.prod(shape)
    itemsize = sat.dtype.itemsize

    layout = _lane_dense_shape(total)
    if layout is None:
        # TODO(synk): total not a multiple of 128 — a pad-to-1024/copy/slice path
        # would keep stores unmasked; fall back to one full-array block (block
        # dims == full dims is always legal) for correctness.
        flat = sat.reshape(1, total)
        return _pallas_identity_2d(flat, 1).reshape(shape)

    rows, cols = layout
    tm = _choose_row_tile(rows, cols, itemsize)
    slab = sat.reshape(rows, cols)                     # glue: lane-dense 2D view
    out = _pallas_identity_2d(slab, tm)                # hot path: pipelined copy
    return out.reshape(shape)


if __name__ == "__main__":
    key = jax.random.PRNGKey(0)
    k_sat, k_other = jax.random.split(key)

    # Small NCHW shapes: batch=2, channels=4, spatial=16x16.
    sat_imgs = jax.random.normal(k_sat, (2, 4, 16, 16), dtype=jnp.float32)
    other_imgs = jax.random.normal(k_other, (2, 3, 16, 16), dtype=jnp.float32)
    batch = TileBatch(SAT_imgs=sat_imgs, other_imgs=other_imgs)

    # Primary path: pure field selection — exactly the module's semantics,
    # no kernel and no copy.
    out_fast = image_selector_forward(batch)
    assert out_fast is sat_imgs

    # Kernel path (contractual kernel boundary): tiled lane-dense identity copy.
    out_kernel = jax.block_until_ready(image_selector_forward_pallas(batch))
    assert out_kernel.shape == sat_imgs.shape
    assert out_kernel.dtype == sat_imgs.dtype
    assert bool(jnp.array_equal(out_kernel, sat_imgs))

    print("KERNEL_OK")
</pallas_src>

<mosaic_0001>
module attributes {stable_mosaic.version = 11 : i64} {
  func.func @_identity_copy_kernel(%arg0: i32, %arg1: memref<8x256xf32, #tpu.memory_space<vmem>>, %arg2: memref<8x256xf32, #tpu.memory_space<vmem>>) attributes {dimension_semantics = [#tpu.dimension_semantics<parallel>], iteration_bounds = array<i64: 1>, scalar_prefetch = 0 : i64, scratch_operands = 0 : i64, tpu.core_type = #tpu.core_type<tc>, window_params = [{transform_indices = @transform_0, window_bounds = array<i64: 8, 256>}, {transform_indices = @transform_1, window_bounds = array<i64: 8, 256>}]} {
    %c0 = arith.constant 0 : index
    %c0_0 = arith.constant 0 : index
    %0 = vector.load %arg1[%c0, %c0_0] : memref<8x256xf32, #tpu.memory_space<vmem>>, vector<8x256xf32>
    %c0_1 = arith.constant 0 : index
    %c0_2 = arith.constant 0 : index
    %1 = vector.load %arg2[%c0_1, %c0_2] : memref<8x256xf32, #tpu.memory_space<vmem>>, vector<8x256xf32>
    tpu.vector_store %arg2[%c0_1, %c0_2], %0 {strides = array<i32>} : memref<8x256xf32, #tpu.memory_space<vmem>>, vector<8x256xf32>,
    return
  }
  func.func @transform_0(%arg0: i32) -> (i32, i32) {
    %c0_i32 = arith.constant 0 : i32
    %c0_i32_0 = arith.constant 0 : i32
    return %arg0, %c0_i32 : i32, i32
  }
  func.func @transform_1(%arg0: i32) -> (i32, i32) {
    %c0_i32 = arith.constant 0 : i32
    %c0_i32_0 = arith.constant 0 : i32
    return %arg0, %c0_i32 : i32, i32
  }
}

</mosaic_0001>

<bundles_post_ra>
// kernel: tpu_custom_call.1
= control target key start
LH: loop header
LB: loop body
LE: loop exit
PB: predicated region body
PF: predicated region fallthrough
CT: control target
= control target key end

     0   :  { %6 = vsyncpa [#allocation3], 0  ;;  %s116_s0 = inlined_call_operand.hbm [shape: f32[8,256], index: 0, kind: input, shape index: {}, may-alias: {0,1}]   ;;  %s117_s1 = inlined_call_operand.hbm [shape: f32[8,256], index: 1, kind: output, shape index: {}, may-alias: {0,1}]  }
   0x1   :  { %7 = vsyncpa [#allocation4], 0  ;;  %s13_s8 = sshll.u32 %s116_s0, 4  ;;  %s98_s9 = smov [#allocation2]   ;;  %s14_s8 = int_to_ptr.hbm [resolvable:$true] %s13_s8 }
   0x2   :  { %s15_s10 = sshll.u32 %s98_s9, 4  ;;  %s16_s10 = int_to_ptr.vmem [resolvable:$true] %s15_s10 }
   0x3   :  { %18 = dma.hbm_to_vmem [thread:$0]  %s14_s8, 256, %s16_s10, [#allocation3]  }
   0x4   :  { %94 = dma.done.wait [#allocation3], 256  }
   0x5   :  { %95 = vsyncadd [#allocation3], 4294967040  ;;  %s99_s11 = smov [#allocation5]   ;;  %s34_s15 = sshll.u32 %s117_s1, 4  ;;  %v23_v0 = vld [vmem:[#allocation2] sm:$0xff]  ;;  %v24_v1 = vld [vmem:[#allocation2 + $0x8] sm:$0xff]  ;;  %s35_s15 = int_to_ptr.hbm [resolvable:$true] %s34_s15 }
   0x6   :  { %s32_s12 = sshll.u32 %s99_s11, 4  ;;  %25 = vst [vmem:[#allocation5] sm:$0xff] %v23_v0  ;;  %s33_s12 = int_to_ptr.vmem [resolvable:$true] %s32_s12 }
   0x7   :  { %26 = vst [vmem:[#allocation5 + $0x8] sm:$0xff] %v24_v1 }
   0x8   :  { %37 = dma.vmem_to_hbm [thread:$0]  %s33_s12, 256, %s35_s15, [#allocation4]  }
   0x9   :  { %96 = dma.done.wait [#allocation4], 256  }
   0xa   :  { %97 = vsyncadd [#allocation4], 4294967040 }
   0xb   :  { %42 = vsyncpa [#allocation3], 1 }
   0xc   :  { %43 = vsyncpa [#allocation4], 1 }

</bundles_post_ra>
